<compile_context>
chip_gen: v7x
topology: tpu7x:2x2x1
jax: 0.10.0
libtpu: 0.0.40
codegen_flags: <defaults>
</compile_context>

<pallas_src>
import math
import functools

import jax
import jax.numpy as jnp
from jax import lax
from jax.experimental import pallas as pl
from jax.experimental.pallas import tpu as pltpu


def _layernorm(x, gamma, beta, eps=1e-5):
    # x: (R, E), gamma/beta: (1, E). Matches torch.nn.LayerNorm (biased variance).
    mean = jnp.mean(x, axis=-1, keepdims=True)
    var = jnp.mean(jnp.square(x - mean), axis=-1, keepdims=True)
    return (x - mean) * lax.rsqrt(var + eps) * gamma + beta


def encoder_layer_kernel(x_ref,
                         wqkv_ref, bqkv_ref, wo_ref,
                         w1_ref, b1_ref, w2_ref,
                         small_ref,
                         o_ref,
                         attn_sc,
                         *, nhead, head_dim):
    bt, s, e = x_ref.shape
    rows = bt * s

    # Flatten to row-major 2-D so projection/FFN matmuls have a wide M dim.
    x2 = x_ref[...].astype(jnp.float32).reshape(rows, e)

    # --- fused Q/K/V projection: one MXU pass over packed bf16 (E, 3E) weight ---
    # (the 1/sqrt(head_dim) scale is already folded into the Q third at pack time)
    qkv = jnp.dot(x2.astype(jnp.bfloat16), wqkv_ref[...],
                  preferred_element_type=jnp.float32) + bqkv_ref[...]
    qkv3 = qkv.reshape(bt, s, 3 * e)

    # Packed small params: rows = [bo, g1, be1, b2, g2, be2], each (1, E), f32.
    small = small_ref[...]
    bo = small[0:1, :]
    g1 = small[1:2, :]
    be1 = small[2:3, :]
    b2 = small[3:4, :]
    g2 = small[4:5, :]
    be2 = small[5:6, :]

    # --- multi-head self-attention, batched over the Bt batch elements ---
    # Per-head scores / softmax / P@V; each head's output is stored into its column
    # slice of the VMEM scratch so the output projection is ONE K=E matmul.
    for h in range(nhead):                               # static loop over heads
        lo = h * head_dim
        qh = qkv3[:, :, lo:lo + head_dim].astype(jnp.bfloat16)              # (Bt,S,hd)
        kh = qkv3[:, :, e + lo:e + lo + head_dim].astype(jnp.bfloat16)      # (Bt,S,hd)
        vh = qkv3[:, :, 2 * e + lo:2 * e + lo + head_dim].astype(jnp.bfloat16)

        sc = jnp.einsum("bqd,bkd->bqk", qh, kh,
                        preferred_element_type=jnp.float32)                 # (Bt,S,S)
        sc = sc - jnp.max(sc, axis=-1, keepdims=True)
        p = jnp.exp(sc)
        p = p * pl.reciprocal(jnp.sum(p, axis=-1, keepdims=True), approx=True)
        ah = jnp.einsum("bqk,bkd->bqd", p.astype(jnp.bfloat16), vh,
                        preferred_element_type=jnp.float32)                 # (Bt,S,hd)
        attn_sc[:, :, lo:lo + head_dim] = ah

    # --- single K=E output projection against bf16 W_o^T ---
    attn2 = jnp.dot(attn_sc[...].reshape(rows, e).astype(jnp.bfloat16), wo_ref[...],
                    preferred_element_type=jnp.float32) + bo

    # --- residual + norm1 (dropout1 = identity in eval) ---
    y2 = _layernorm(x2 + attn2, g1, be1)

    # --- feed-forward: linear1 -> relu -> linear2 (dropout = identity) ---
    h1 = jnp.dot(y2.astype(jnp.bfloat16), w1_ref[...],
                 preferred_element_type=jnp.float32) + b1_ref[...]
    h1 = jnp.maximum(h1, 0.0)
    ff2 = jnp.dot(h1.astype(jnp.bfloat16), w2_ref[...],
                  preferred_element_type=jnp.float32) + b2

    # --- residual + norm2 (dropout2 = identity in eval) ---
    z2 = _layernorm(y2 + ff2, g2, be2)

    o_ref[...] = z2.reshape(bt, s, e).astype(o_ref.dtype)


def pack_layer_params(p, head_dim):
    """Pre-transpose / pack torch-layout weights once, outside the kernel.

    Matmul weights are stored in bf16 (native MXU dtype on v5e/v6e/v7x); biases and
    LayerNorm params stay f32 (added to / used by f32 elementwise math).
    The attention scale is folded into the Q segment of the packed QKV weight+bias.
    """
    scale = 1.0 / math.sqrt(head_dim)
    wqkv_t = jnp.concatenate([p["wq"] * scale, p["wk"], p["wv"]], axis=0).T  # (E, 3E)
    bqkv = jnp.concatenate([p["bq"] * scale, p["bk"], p["bv"]], axis=1)      # (1, 3E)
    small = jnp.concatenate([p["bo"], p["g1"], p["be1"],
                             p["b2"], p["g2"], p["be2"]], axis=0)            # (6, E)
    return {
        "wqkv_t": wqkv_t.astype(jnp.bfloat16),   # (E, 3E)
        "bqkv": bqkv.astype(jnp.float32),        # (1, 3E)
        "wo_t": p["wo"].T.astype(jnp.bfloat16),  # (E, E)
        "w1_t": p["w1"].T.astype(jnp.bfloat16),  # (E, dff)
        "b1": p["b1"].astype(jnp.float32),       # (1, dff)
        "w2_t": p["w2"].T.astype(jnp.bfloat16),  # (dff, E)
        "small": small.astype(jnp.float32),      # (6, E)
    }


def _vmem_limit_bytes():
    # Derive from hardware with ~25% headroom (v7x: 64 MiB -> 48 MiB, v6e/v5e: 128 -> 96).
    try:
        cap = pltpu.get_tpu_info().vmem_capacity_bytes
    except Exception:
        cap = 64 * 1024 * 1024
    return int(cap * 0.75)


def _pick_block_batch(N, S, E, dff, nhead, vmem_budget_bytes):
    """Largest divisor of N whose per-step activation footprint fits the VMEM budget."""
    def act_bytes(bt):
        rows = bt * S
        return (4 * rows * E * 4        # x block + out block, double-buffered
                + rows * 3 * E * 4      # qkv
                + 3 * bt * S * S * 4    # per-head score / prob temporaries
                + 2 * rows * E * 4      # attention scratch + y2
                + rows * dff * 4        # FFN intermediate
                + rows * E * 4)         # ff2
    weight_bytes = (E * 3 * E + E * E + 2 * E * dff) * 2 + (3 * E + dff + 6 * E) * 4
    budget = max(vmem_budget_bytes - weight_bytes - (4 << 20), 1 << 20)
    best = 1
    for bt in range(1, N + 1):
        if N % bt == 0 and act_bytes(bt) <= budget:
            best = bt
    # TODO(synk): on v7x prefer a block giving an even grid length >= 2 so the
    #             "parallel" axis splits across both TensorCores.
    return best


def _const_spec(arr):
    """Full-array block, constant index map, single-buffered (loop-invariant weight)."""
    ndim = arr.ndim
    idx = lambda b, _n=ndim: (0,) * _n
    try:
        return pl.BlockSpec(arr.shape, idx, pipeline_mode=pl.Buffered(1))
    except TypeError:   # older jax without pipeline_mode: fall back to default buffering
        return pl.BlockSpec(arr.shape, idx)


def _encoder_layer_batch_major(x_bse, packed, *, nhead, head_dim, block_batch,
                               vmem_limit):
    """x_bse: (N, S, E) batch-major. Returns (N, S, E)."""
    N, S, E = x_bse.shape
    assert N % block_batch == 0

    weight_args = (packed["wqkv_t"], packed["bqkv"], packed["wo_t"],
                   packed["w1_t"], packed["b1"], packed["w2_t"], packed["small"])

    return pl.pallas_call(
        functools.partial(encoder_layer_kernel, nhead=nhead, head_dim=head_dim),
        out_shape=jax.ShapeDtypeStruct((N, S, E), x_bse.dtype),
        grid_spec=pltpu.PrefetchScalarGridSpec(
            num_scalar_prefetch=0,
            grid=(N // block_batch,),
            in_specs=[pl.BlockSpec((block_batch, S, E), lambda b: (b, 0, 0))]
                     + [_const_spec(w) for w in weight_args],
            out_specs=pl.BlockSpec((block_batch, S, E), lambda b: (b, 0, 0)),
            scratch_shapes=[pltpu.VMEM((block_batch, S, E), jnp.float32)],
        ),
        compiler_params=pltpu.CompilerParams(
            dimension_semantics=("parallel",),
            vmem_limit_bytes=vmem_limit,
        ),
    )(x_bse, *weight_args)


def transformer_encoder(src, packed_layers, *, nhead, block_batch=None, final_norm=None):
    """src: (S, N, E) float32 (PyTorch layout). Returns (S, N, E).

    packed_layers: list of packed per-layer params (see pack_layer_params).
    final_norm: optional (gamma, beta) each (1, E) for TransformerEncoder.norm.
    """
    S, N, E = src.shape
    assert E % nhead == 0
    head_dim = E // nhead
    dff = packed_layers[0]["w1_t"].shape[1]
    vmem_limit = _vmem_limit_bytes()
    if block_batch is None:
        block_batch = _pick_block_batch(N, S, E, dff, nhead, vmem_limit)

    # One layout change for the whole stack (amortized over num_layers).
    x = jnp.transpose(src, (1, 0, 2))                      # (N, S, E)
    for packed in packed_layers:
        x = _encoder_layer_batch_major(x, packed, nhead=nhead, head_dim=head_dim,
                                       block_batch=block_batch, vmem_limit=vmem_limit)
    out = jnp.transpose(x, (1, 0, 2))                      # back to (S, N, E)

    if final_norm is not None:
        g, b = final_norm
        m = jnp.mean(out, -1, keepdims=True)
        v = jnp.mean((out - m) ** 2, -1, keepdims=True)
        out = (out - m) * lax.rsqrt(v + 1e-5) * g + b
    return out


def _reference(src, raw_layers, *, nhead):
    # Pure-JAX f32 reference of the same math for a sanity check.
    S, N, E = src.shape
    hd = E // nhead
    x = jnp.transpose(src, (1, 0, 2)).astype(jnp.float32)  # (N, S, E)

    def ln(t, g, b, eps=1e-5):
        m = jnp.mean(t, -1, keepdims=True)
        v = jnp.mean((t - m) ** 2, -1, keepdims=True)
        return (t - m) / jnp.sqrt(v + eps) * g + b

    for p in raw_layers:
        q = jnp.einsum("nse,fe->nsf", x, p["wq"]) + p["bq"]
        k = jnp.einsum("nse,fe->nsf", x, p["wk"]) + p["bk"]
        v = jnp.einsum("nse,fe->nsf", x, p["wv"]) + p["bv"]
        q = q * (1.0 / math.sqrt(hd))
        q = q.reshape(N, S, nhead, hd)
        k = k.reshape(N, S, nhead, hd)
        v = v.reshape(N, S, nhead, hd)
        s = jnp.einsum("nqhd,nkhd->nhqk", q, k)
        pr = jax.nn.softmax(s, axis=-1)
        a = jnp.einsum("nhqk,nkhd->nqhd", pr, v).reshape(N, S, E)
        a = jnp.einsum("nse,fe->nsf", a, p["wo"]) + p["bo"]
        y = ln(x + a, p["g1"], p["be1"])
        h1 = jax.nn.relu(jnp.einsum("nse,fe->nsf", y, p["w1"]) + p["b1"])
        ff = jnp.einsum("nsf,ef->nse", h1, p["w2"]) + p["b2"]
        x = ln(y + ff, p["g2"], p["be2"])
    return jnp.transpose(x, (1, 0, 2))


if __name__ == "__main__":
    # Small shapes: seq=8, batch=2, d_model=32, nhead=4, dim_feedforward=64, 2 layers
    S, N, E = 8, 2, 32
    nhead = 4
    dff = 64
    num_layers = 2
    head_dim = E // nhead

    key = jax.random.PRNGKey(0)
    ks = jax.random.split(key, 12)

    def xavier(k, shape):
        fan_in, fan_out = shape[1], shape[0]
        lim = math.sqrt(6.0 / (fan_in + fan_out))
        return jax.random.uniform(k, shape, jnp.float32, -lim, lim)

    raw = {
        # in_proj split into q/k/v weights, each (E, E), biases as (1, E) rows
        "wq": xavier(ks[0], (E, E)), "bq": jax.random.normal(ks[1], (1, E)) * 0.02,
        "wk": xavier(ks[2], (E, E)), "bk": jax.random.normal(ks[3], (1, E)) * 0.02,
        "wv": xavier(ks[4], (E, E)), "bv": jax.random.normal(ks[5], (1, E)) * 0.02,
        "wo": xavier(ks[6], (E, E)), "bo": jax.random.normal(ks[7], (1, E)) * 0.02,
        "w1": xavier(ks[8], (dff, E)), "b1": jax.random.normal(ks[9], (1, dff)) * 0.02,
        "w2": xavier(ks[10], (E, dff)), "b2": jax.random.normal(ks[11], (1, E)) * 0.02,
        # LayerNorm params (torch default init: weight=1, bias=0)
        "g1": jnp.ones((1, E), jnp.float32), "be1": jnp.zeros((1, E), jnp.float32),
        "g2": jnp.ones((1, E), jnp.float32), "be2": jnp.zeros((1, E), jnp.float32),
    }

    # _get_clones -> identical deep copies of the layer for every depth.
    raw_layers = [raw] * num_layers
    packed_layers = [pack_layer_params(raw, head_dim)] * num_layers

    src = jax.random.normal(jax.random.PRNGKey(42), (S, N, E), jnp.float32)

    out = transformer_encoder(src, packed_layers, nhead=nhead)
    out = jax.block_until_ready(out)

    ref = _reference(src, raw_layers, nhead=nhead)
    assert out.shape == (S, N, E)
    err = float(jnp.max(jnp.abs(out.astype(jnp.float32) - ref)))
    # bf16 MXU operands -> compare against the f32 reference with a bf16-level tolerance.
    assert err < 5e-2, f"mismatch vs pure-JAX reference, max abs err = {err}"

    print("KERNEL_OK")
</pallas_src>

<mosaic_0001>
module attributes {stable_mosaic.version = 11 : i64} {
  func.func @encoder_layer_kernel(%arg0: i32, %arg1: memref<2x8x32xf32, #tpu.memory_space<vmem>>, %arg2: memref<32x96xbf16, #tpu.memory_space<vmem>>, %arg3: memref<1x96xf32, #tpu.memory_space<vmem>>, %arg4: memref<32x32xbf16, #tpu.memory_space<vmem>>, %arg5: memref<32x64xbf16, #tpu.memory_space<vmem>>, %arg6: memref<1x64xf32, #tpu.memory_space<vmem>>, %arg7: memref<64x32xbf16, #tpu.memory_space<vmem>>, %arg8: memref<6x32xf32, #tpu.memory_space<vmem>>, %arg9: memref<2x8x32xf32, #tpu.memory_space<vmem>>, %arg10: memref<2x8x32xf32, #tpu.memory_space<vmem>>) attributes {dimension_semantics = [#tpu.dimension_semantics<parallel>], iteration_bounds = array<i64: 1>, scalar_prefetch = 0 : i64, scratch_operands = 1 : i64, tpu.core_type = #tpu.core_type<tc>, window_params = [{transform_indices = @transform_0, window_bounds = array<i64: 2, 8, 32>}, {pipeline_mode = #tpu.pipeline_mode<synchronous>, transform_indices = @transform_1, window_bounds = array<i64: 32, 96>}, {pipeline_mode = #tpu.pipeline_mode<synchronous>, transform_indices = @transform_2, window_bounds = array<i64: 1, 96>}, {pipeline_mode = #tpu.pipeline_mode<synchronous>, transform_indices = @transform_3, window_bounds = array<i64: 32, 32>}, {pipeline_mode = #tpu.pipeline_mode<synchronous>, transform_indices = @transform_4, window_bounds = array<i64: 32, 64>}, {pipeline_mode = #tpu.pipeline_mode<synchronous>, transform_indices = @transform_5, window_bounds = array<i64: 1, 64>}, {pipeline_mode = #tpu.pipeline_mode<synchronous>, transform_indices = @transform_6, window_bounds = array<i64: 64, 32>}, {pipeline_mode = #tpu.pipeline_mode<synchronous>, transform_indices = @transform_7, window_bounds = array<i64: 6, 32>}, {transform_indices = @transform_8, window_bounds = array<i64: 2, 8, 32>}]} {
    %c0 = arith.constant 0 : index
    %c0_0 = arith.constant 0 : index
    %c0_1 = arith.constant 0 : index
    %0 = vector.load %arg1[%c0, %c0_0, %c0_1] : memref<2x8x32xf32, #tpu.memory_space<vmem>>, vector<2x8x32xf32>
    %1 = vector.shape_cast %0 : vector<2x8x32xf32> to vector<16x32xf32>
    %2 = arith.truncf %1 : vector<16x32xf32> to vector<16x32xbf16>
    %c0_2 = arith.constant 0 : index
    %c0_3 = arith.constant 0 : index
    %3 = vector.load %arg2[%c0_2, %c0_3] : memref<32x96xbf16, #tpu.memory_space<vmem>>, vector<32x96xbf16>
    %cst = arith.constant dense<0.000000e+00> : vector<16x96xf32>
    %4 = tpu.matmul %2, %3, %cst {dimension_numbers = #tpu.dot_dimension_numbers<[1], [0], [0], [1], [0, 0, 1, 1], [], []>} : vector<16x32xbf16>, vector<32x96xbf16>, vector<16x96xf32> -> vector<16x96xf32>
    %c0_4 = arith.constant 0 : index
    %c0_5 = arith.constant 0 : index
    %5 = vector.load %arg3[%c0_4, %c0_5] : memref<1x96xf32, #tpu.memory_space<vmem>>, vector<1x96xf32>
    %6 = vector.broadcast %5 : vector<1x96xf32> to vector<16x96xf32>
    %7 = arith.addf %4, %6 : vector<16x96xf32>
    %8 = vector.shape_cast %7 : vector<16x96xf32> to vector<2x8x96xf32>
    %c0_6 = arith.constant 0 : index
    %c0_7 = arith.constant 0 : index
    %9 = vector.load %arg8[%c0_6, %c0_7] : memref<6x32xf32, #tpu.memory_space<vmem>>, vector<6x32xf32>
    %10 = vector.extract_strided_slice %9 {offsets = [0, 0], sizes = [1, 32], strides = [1, 1]} : vector<6x32xf32> to vector<1x32xf32>
    %11 = vector.extract_strided_slice %9 {offsets = [1, 0], sizes = [1, 32], strides = [1, 1]} : vector<6x32xf32> to vector<1x32xf32>
    %12 = vector.extract_strided_slice %9 {offsets = [2, 0], sizes = [1, 32], strides = [1, 1]} : vector<6x32xf32> to vector<1x32xf32>
    %13 = vector.extract_strided_slice %9 {offsets = [3, 0], sizes = [1, 32], strides = [1, 1]} : vector<6x32xf32> to vector<1x32xf32>
    %14 = vector.extract_strided_slice %9 {offsets = [4, 0], sizes = [1, 32], strides = [1, 1]} : vector<6x32xf32> to vector<1x32xf32>
    %15 = vector.extract_strided_slice %9 {offsets = [5, 0], sizes = [1, 32], strides = [1, 1]} : vector<6x32xf32> to vector<1x32xf32>
    %16 = vector.extract_strided_slice %8 {offsets = [0, 0, 0], sizes = [2, 8, 8], strides = [1, 1, 1]} : vector<2x8x96xf32> to vector<2x8x8xf32>
    %17 = arith.truncf %16 : vector<2x8x8xf32> to vector<2x8x8xbf16>
    %18 = vector.extract_strided_slice %8 {offsets = [0, 0, 32], sizes = [2, 8, 8], strides = [1, 1, 1]} : vector<2x8x96xf32> to vector<2x8x8xf32>
    %19 = arith.truncf %18 : vector<2x8x8xf32> to vector<2x8x8xbf16>
    %20 = vector.extract_strided_slice %8 {offsets = [0, 0, 64], sizes = [2, 8, 8], strides = [1, 1, 1]} : vector<2x8x96xf32> to vector<2x8x8xf32>
    %21 = arith.truncf %20 : vector<2x8x8xf32> to vector<2x8x8xbf16>
    "tpu.trace_start"() <{level = 10 : i32, message = "bqd,bkd->bqk"}> : () -> ()
    %cst_8 = arith.constant dense<0.000000e+00> : vector<2x8x8xf32>
    %22 = tpu.matmul %17, %19, %cst_8 {dimension_numbers = #tpu.dot_dimension_numbers<[2], [2], [1], [1], [0, 0, 0, 1, 1, 1], [0], [0]>} : vector<2x8x8xbf16>, vector<2x8x8xbf16>, vector<2x8x8xf32> -> vector<2x8x8xf32>
    "tpu.trace_stop"() : () -> ()
    %cst_9 = arith.constant dense<0xFF800000> : vector<2x8xf32>
    %23 = vector.multi_reduction <maximumf>, %22, %cst_9 [2] : vector<2x8x8xf32> to vector<2x8xf32>
    %24 = vector.shape_cast %23 : vector<2x8xf32> to vector<2x8x1xf32>
    %25 = vector.broadcast %24 : vector<2x8x1xf32> to vector<2x8x8xf32>
    %26 = arith.subf %22, %25 : vector<2x8x8xf32>
    %27 = math.exp %26 : vector<2x8x8xf32>
    %cst_10 = arith.constant dense<0.000000e+00> : vector<2x8xf32>
    %28 = vector.multi_reduction <add>, %27, %cst_10 [2] : vector<2x8x8xf32> to vector<2x8xf32>
    %29 = vector.shape_cast %28 : vector<2x8xf32> to vector<2x8x1xf32>
    %30 = tpu.reciprocal %29 {approx = true} : vector<2x8x1xf32> -> vector<2x8x1xf32>
    %31 = vector.broadcast %30 : vector<2x8x1xf32> to vector<2x8x8xf32>
    %32 = arith.mulf %27, %31 : vector<2x8x8xf32>
    %33 = arith.truncf %32 : vector<2x8x8xf32> to vector<2x8x8xbf16>
    "tpu.trace_start"() <{level = 10 : i32, message = "bqk,bkd->bqd"}> : () -> ()
    %cst_11 = arith.constant dense<0.000000e+00> : vector<2x8x8xf32>
    %34 = tpu.matmul %33, %21, %cst_11 {dimension_numbers = #tpu.dot_dimension_numbers<[2], [1], [1], [2], [0, 0, 0, 1, 1, 2], [0], [0]>} : vector<2x8x8xbf16>, vector<2x8x8xbf16>, vector<2x8x8xf32> -> vector<2x8x8xf32>
    "tpu.trace_stop"() : () -> ()
    %c0_12 = arith.constant 0 : index
    %c0_13 = arith.constant 0 : index
    %c0_14 = arith.constant 0 : index
    %35 = vector.load %arg10[%c0_12, %c0_13, %c0_14] : memref<2x8x32xf32, #tpu.memory_space<vmem>>, vector<2x8x8xf32>
    tpu.vector_store %arg10[%c0_12, %c0_13, %c0_14], %34 {strides = array<i32>} : memref<2x8x32xf32, #tpu.memory_space<vmem>>, vector<2x8x8xf32>,
    %36 = vector.extract_strided_slice %8 {offsets = [0, 0, 8], sizes = [2, 8, 8], strides = [1, 1, 1]} : vector<2x8x96xf32> to vector<2x8x8xf32>
    %37 = arith.truncf %36 : vector<2x8x8xf32> to vector<2x8x8xbf16>
    %38 = vector.extract_strided_slice %8 {offsets = [0, 0, 40], sizes = [2, 8, 8], strides = [1, 1, 1]} : vector<2x8x96xf32> to vector<2x8x8xf32>
    %39 = arith.truncf %38 : vector<2x8x8xf32> to vector<2x8x8xbf16>
    %40 = vector.extract_strided_slice %8 {offsets = [0, 0, 72], sizes = [2, 8, 8], strides = [1, 1, 1]} : vector<2x8x96xf32> to vector<2x8x8xf32>
    %41 = arith.truncf %40 : vector<2x8x8xf32> to vector<2x8x8xbf16>
    "tpu.trace_start"() <{level = 10 : i32, message = "bqd,bkd->bqk"}> : () -> ()
    %cst_15 = arith.constant dense<0.000000e+00> : vector<2x8x8xf32>
    %42 = tpu.matmul %37, %39, %cst_15 {dimension_numbers = #tpu.dot_dimension_numbers<[2], [2], [1], [1], [0, 0, 0, 1, 1, 1], [0], [0]>} : vector<2x8x8xbf16>, vector<2x8x8xbf16>, vector<2x8x8xf32> -> vector<2x8x8xf32>
    "tpu.trace_stop"() : () -> ()
    %cst_16 = arith.constant dense<0xFF800000> : vector<2x8xf32>
    %43 = vector.multi_reduction <maximumf>, %42, %cst_16 [2] : vector<2x8x8xf32> to vector<2x8xf32>
    %44 = vector.shape_cast %43 : vector<2x8xf32> to vector<2x8x1xf32>
    %45 = vector.broadcast %44 : vector<2x8x1xf32> to vector<2x8x8xf32>
    %46 = arith.subf %42, %45 : vector<2x8x8xf32>
    %47 = math.exp %46 : vector<2x8x8xf32>
    %cst_17 = arith.constant dense<0.000000e+00> : vector<2x8xf32>
    %48 = vector.multi_reduction <add>, %47, %cst_17 [2] : vector<2x8x8xf32> to vector<2x8xf32>
    %49 = vector.shape_cast %48 : vector<2x8xf32> to vector<2x8x1xf32>
    %50 = tpu.reciprocal %49 {approx = true} : vector<2x8x1xf32> -> vector<2x8x1xf32>
    %51 = vector.broadcast %50 : vector<2x8x1xf32> to vector<2x8x8xf32>
    %52 = arith.mulf %47, %51 : vector<2x8x8xf32>
    %53 = arith.truncf %52 : vector<2x8x8xf32> to vector<2x8x8xbf16>
    "tpu.trace_start"() <{level = 10 : i32, message = "bqk,bkd->bqd"}> : () -> ()
    %cst_18 = arith.constant dense<0.000000e+00> : vector<2x8x8xf32>
    %54 = tpu.matmul %53, %41, %cst_18 {dimension_numbers = #tpu.dot_dimension_numbers<[2], [1], [1], [2], [0, 0, 0, 1, 1, 2], [0], [0]>} : vector<2x8x8xbf16>, vector<2x8x8xbf16>, vector<2x8x8xf32> -> vector<2x8x8xf32>
    "tpu.trace_stop"() : () -> ()
    %c0_19 = arith.constant 0 : index
    %c0_20 = arith.constant 0 : index
    %c8 = arith.constant 8 : index
    %55 = vector.load %arg10[%c0_19, %c0_20, %c8] : memref<2x8x32xf32, #tpu.memory_space<vmem>>, vector<2x8x8xf32>
    tpu.vector_store %arg10[%c0_19, %c0_20, %c8], %54 {strides = array<i32>} : memref<2x8x32xf32, #tpu.memory_space<vmem>>, vector<2x8x8xf32>,
    %56 = vector.extract_strided_slice %8 {offsets = [0, 0, 16], sizes = [2, 8, 8], strides = [1, 1, 1]} : vector<2x8x96xf32> to vector<2x8x8xf32>
    %57 = arith.truncf %56 : vector<2x8x8xf32> to vector<2x8x8xbf16>
    %58 = vector.extract_strided_slice %8 {offsets = [0, 0, 48], sizes = [2, 8, 8], strides = [1, 1, 1]} : vector<2x8x96xf32> to vector<2x8x8xf32>
    %59 = arith.truncf %58 : vector<2x8x8xf32> to vector<2x8x8xbf16>
    %60 = vector.extract_strided_slice %8 {offsets = [0, 0, 80], sizes = [2, 8, 8], strides = [1, 1, 1]} : vector<2x8x96xf32> to vector<2x8x8xf32>
    %61 = arith.truncf %60 : vector<2x8x8xf32> to vector<2x8x8xbf16>
    "tpu.trace_start"() <{level = 10 : i32, message = "bqd,bkd->bqk"}> : () -> ()
    %cst_21 = arith.constant dense<0.000000e+00> : vector<2x8x8xf32>
    %62 = tpu.matmul %57, %59, %cst_21 {dimension_numbers = #tpu.dot_dimension_numbers<[2], [2], [1], [1], [0, 0, 0, 1, 1, 1], [0], [0]>} : vector<2x8x8xbf16>, vector<2x8x8xbf16>, vector<2x8x8xf32> -> vector<2x8x8xf32>
    "tpu.trace_stop"() : () -> ()
    %cst_22 = arith.constant dense<0xFF800000> : vector<2x8xf32>
    %63 = vector.multi_reduction <maximumf>, %62, %cst_22 [2] : vector<2x8x8xf32> to vector<2x8xf32>
    %64 = vector.shape_cast %63 : vector<2x8xf32> to vector<2x8x1xf32>
    %65 = vector.broadcast %64 : vector<2x8x1xf32> to vector<2x8x8xf32>
    %66 = arith.subf %62, %65 : vector<2x8x8xf32>
    %67 = math.exp %66 : vector<2x8x8xf32>
    %cst_23 = arith.constant dense<0.000000e+00> : vector<2x8xf32>
    %68 = vector.multi_reduction <add>, %67, %cst_23 [2] : vector<2x8x8xf32> to vector<2x8xf32>
    %69 = vector.shape_cast %68 : vector<2x8xf32> to vector<2x8x1xf32>
    %70 = tpu.reciprocal %69 {approx = true} : vector<2x8x1xf32> -> vector<2x8x1xf32>
    %71 = vector.broadcast %70 : vector<2x8x1xf32> to vector<2x8x8xf32>
    %72 = arith.mulf %67, %71 : vector<2x8x8xf32>
    %73 = arith.truncf %72 : vector<2x8x8xf32> to vector<2x8x8xbf16>
    "tpu.trace_start"() <{level = 10 : i32, message = "bqk,bkd->bqd"}> : () -> ()
    %cst_24 = arith.constant dense<0.000000e+00> : vector<2x8x8xf32>
    %74 = tpu.matmul %73, %61, %cst_24 {dimension_numbers = #tpu.dot_dimension_numbers<[2], [1], [1], [2], [0, 0, 0, 1, 1, 2], [0], [0]>} : vector<2x8x8xbf16>, vector<2x8x8xbf16>, vector<2x8x8xf32> -> vector<2x8x8xf32>
    "tpu.trace_stop"() : () -> ()
    %c0_25 = arith.constant 0 : index
    %c0_26 = arith.constant 0 : index
    %c16 = arith.constant 16 : index
    %75 = vector.load %arg10[%c0_25, %c0_26, %c16] : memref<2x8x32xf32, #tpu.memory_space<vmem>>, vector<2x8x8xf32>
    tpu.vector_store %arg10[%c0_25, %c0_26, %c16], %74 {strides = array<i32>} : memref<2x8x32xf32, #tpu.memory_space<vmem>>, vector<2x8x8xf32>,
    %76 = vector.extract_strided_slice %8 {offsets = [0, 0, 24], sizes = [2, 8, 8], strides = [1, 1, 1]} : vector<2x8x96xf32> to vector<2x8x8xf32>
    %77 = arith.truncf %76 : vector<2x8x8xf32> to vector<2x8x8xbf16>
    %78 = vector.extract_strided_slice %8 {offsets = [0, 0, 56], sizes = [2, 8, 8], strides = [1, 1, 1]} : vector<2x8x96xf32> to vector<2x8x8xf32>
    %79 = arith.truncf %78 : vector<2x8x8xf32> to vector<2x8x8xbf16>
    %80 = vector.extract_strided_slice %8 {offsets = [0, 0, 88], sizes = [2, 8, 8], strides = [1, 1, 1]} : vector<2x8x96xf32> to vector<2x8x8xf32>
    %81 = arith.truncf %80 : vector<2x8x8xf32> to vector<2x8x8xbf16>
    "tpu.trace_start"() <{level = 10 : i32, message = "bqd,bkd->bqk"}> : () -> ()
    %cst_27 = arith.constant dense<0.000000e+00> : vector<2x8x8xf32>
    %82 = tpu.matmul %77, %79, %cst_27 {dimension_numbers = #tpu.dot_dimension_numbers<[2], [2], [1], [1], [0, 0, 0, 1, 1, 1], [0], [0]>} : vector<2x8x8xbf16>, vector<2x8x8xbf16>, vector<2x8x8xf32> -> vector<2x8x8xf32>
    "tpu.trace_stop"() : () -> ()
    %cst_28 = arith.constant dense<0xFF800000> : vector<2x8xf32>
    %83 = vector.multi_reduction <maximumf>, %82, %cst_28 [2] : vector<2x8x8xf32> to vector<2x8xf32>
    %84 = vector.shape_cast %83 : vector<2x8xf32> to vector<2x8x1xf32>
    %85 = vector.broadcast %84 : vector<2x8x1xf32> to vector<2x8x8xf32>
    %86 = arith.subf %82, %85 : vector<2x8x8xf32>
    %87 = math.exp %86 : vector<2x8x8xf32>
    %cst_29 = arith.constant dense<0.000000e+00> : vector<2x8xf32>
    %88 = vector.multi_reduction <add>, %87, %cst_29 [2] : vector<2x8x8xf32> to vector<2x8xf32>
    %89 = vector.shape_cast %88 : vector<2x8xf32> to vector<2x8x1xf32>
    %90 = tpu.reciprocal %89 {approx = true} : vector<2x8x1xf32> -> vector<2x8x1xf32>
    %91 = vector.broadcast %90 : vector<2x8x1xf32> to vector<2x8x8xf32>
    %92 = arith.mulf %87, %91 : vector<2x8x8xf32>
    %93 = arith.truncf %92 : vector<2x8x8xf32> to vector<2x8x8xbf16>
    "tpu.trace_start"() <{level = 10 : i32, message = "bqk,bkd->bqd"}> : () -> ()
    %cst_30 = arith.constant dense<0.000000e+00> : vector<2x8x8xf32>
    %94 = tpu.matmul %93, %81, %cst_30 {dimension_numbers = #tpu.dot_dimension_numbers<[2], [1], [1], [2], [0, 0, 0, 1, 1, 2], [0], [0]>} : vector<2x8x8xbf16>, vector<2x8x8xbf16>, vector<2x8x8xf32> -> vector<2x8x8xf32>
    "tpu.trace_stop"() : () -> ()
    %c0_31 = arith.constant 0 : index
    %c0_32 = arith.constant 0 : index
    %c24 = arith.constant 24 : index
    %95 = vector.load %arg10[%c0_31, %c0_32, %c24] : memref<2x8x32xf32, #tpu.memory_space<vmem>>, vector<2x8x8xf32>
    tpu.vector_store %arg10[%c0_31, %c0_32, %c24], %94 {strides = array<i32>} : memref<2x8x32xf32, #tpu.memory_space<vmem>>, vector<2x8x8xf32>,
    %c0_33 = arith.constant 0 : index
    %c0_34 = arith.constant 0 : index
    %c0_35 = arith.constant 0 : index
    %96 = vector.load %arg10[%c0_33, %c0_34, %c0_35] : memref<2x8x32xf32, #tpu.memory_space<vmem>>, vector<2x8x32xf32>
    %97 = vector.shape_cast %96 : vector<2x8x32xf32> to vector<16x32xf32>
    %98 = arith.truncf %97 : vector<16x32xf32> to vector<16x32xbf16>
    %c0_36 = arith.constant 0 : index
    %c0_37 = arith.constant 0 : index
    %99 = vector.load %arg4[%c0_36, %c0_37] : memref<32x32xbf16, #tpu.memory_space<vmem>>, vector<32x32xbf16>
    %cst_38 = arith.constant dense<0.000000e+00> : vector<16x32xf32>
    %100 = tpu.matmul %98, %99, %cst_38 {dimension_numbers = #tpu.dot_dimension_numbers<[1], [0], [0], [1], [0, 0, 1, 1], [], []>} : vector<16x32xbf16>, vector<32x32xbf16>, vector<16x32xf32> -> vector<16x32xf32>
    %101 = vector.broadcast %10 : vector<1x32xf32> to vector<16x32xf32>
    %102 = arith.addf %100, %101 : vector<16x32xf32>
    %103 = arith.addf %1, %102 : vector<16x32xf32>
    %cst_39 = arith.constant dense<0.000000e+00> : vector<16xf32>
    %104 = vector.multi_reduction <add>, %103, %cst_39 [1] : vector<16x32xf32> to vector<16xf32>
    %105 = vector.shape_cast %104 : vector<16xf32> to vector<16x1xf32>
    %cst_40 = arith.constant 3.200000e+01 : f32
    %106 = vector.broadcast %cst_40 : f32 to vector<16x1xf32>
    %107 = arith.divf %105, %106 : vector<16x1xf32>
    %108 = vector.broadcast %107 : vector<16x1xf32> to vector<16x32xf32>
    %109 = arith.subf %103, %108 : vector<16x32xf32>
    %110 = arith.mulf %109, %109 : vector<16x32xf32>
    %cst_41 = arith.constant dense<0.000000e+00> : vector<16xf32>
    %111 = vector.multi_reduction <add>, %110, %cst_41 [1] : vector<16x32xf32> to vector<16xf32>
    %112 = vector.shape_cast %111 : vector<16xf32> to vector<16x1xf32>
    %cst_42 = arith.constant 3.200000e+01 : f32
    %113 = vector.broadcast %cst_42 : f32 to vector<16x1xf32>
    %114 = arith.divf %112, %113 : vector<16x1xf32>
    %115 = vector.broadcast %107 : vector<16x1xf32> to vector<16x32xf32>
    %116 = arith.subf %103, %115 : vector<16x32xf32>
    %cst_43 = arith.constant 9.99999974E-6 : f32
    %117 = vector.broadcast %cst_43 : f32 to vector<16x1xf32>
    %118 = arith.addf %114, %117 : vector<16x1xf32>
    %119 = math.rsqrt %118 : vector<16x1xf32>
    %120 = vector.broadcast %119 : vector<16x1xf32> to vector<16x32xf32>
    %121 = arith.mulf %116, %120 : vector<16x32xf32>
    %122 = vector.broadcast %11 : vector<1x32xf32> to vector<16x32xf32>
    %123 = arith.mulf %121, %122 : vector<16x32xf32>
    %124 = vector.broadcast %12 : vector<1x32xf32> to vector<16x32xf32>
    %125 = arith.addf %123, %124 : vector<16x32xf32>
    %126 = arith.truncf %125 : vector<16x32xf32> to vector<16x32xbf16>
    %c0_44 = arith.constant 0 : index
    %c0_45 = arith.constant 0 : index
    %127 = vector.load %arg5[%c0_44, %c0_45] : memref<32x64xbf16, #tpu.memory_space<vmem>>, vector<32x64xbf16>
    %cst_46 = arith.constant dense<0.000000e+00> : vector<16x64xf32>
    %128 = tpu.matmul %126, %127, %cst_46 {dimension_numbers = #tpu.dot_dimension_numbers<[1], [0], [0], [1], [0, 0, 1, 1], [], []>} : vector<16x32xbf16>, vector<32x64xbf16>, vector<16x64xf32> -> vector<16x64xf32>
    %c0_47 = arith.constant 0 : index
    %c0_48 = arith.constant 0 : index
    %129 = vector.load %arg6[%c0_47, %c0_48] : memref<1x64xf32, #tpu.memory_space<vmem>>, vector<1x64xf32>
    %130 = vector.broadcast %129 : vector<1x64xf32> to vector<16x64xf32>
    %131 = arith.addf %128, %130 : vector<16x64xf32>
    %cst_49 = arith.constant 0.000000e+00 : f32
    %132 = vector.broadcast %cst_49 : f32 to vector<16x64xf32>
    %133 = arith.maximumf %131, %132 : vector<16x64xf32>
    %134 = arith.truncf %133 : vector<16x64xf32> to vector<16x64xbf16>
    %c0_50 = arith.constant 0 : index
    %c0_51 = arith.constant 0 : index
    %135 = vector.load %arg7[%c0_50, %c0_51] : memref<64x32xbf16, #tpu.memory_space<vmem>>, vector<64x32xbf16>
    %cst_52 = arith.constant dense<0.000000e+00> : vector<16x32xf32>
    %136 = tpu.matmul %134, %135, %cst_52 {dimension_numbers = #tpu.dot_dimension_numbers<[1], [0], [0], [1], [0, 0, 1, 1], [], []>} : vector<16x64xbf16>, vector<64x32xbf16>, vector<16x32xf32> -> vector<16x32xf32>
    %137 = vector.broadcast %13 : vector<1x32xf32> to vector<16x32xf32>
    %138 = arith.addf %136, %137 : vector<16x32xf32>
    %139 = arith.addf %125, %138 : vector<16x32xf32>
    %cst_53 = arith.constant dense<0.000000e+00> : vector<16xf32>
    %140 = vector.multi_reduction <add>, %139, %cst_53 [1] : vector<16x32xf32> to vector<16xf32>
    %141 = vector.shape_cast %140 : vector<16xf32> to vector<16x1xf32>
    %cst_54 = arith.constant 3.200000e+01 : f32
    %142 = vector.broadcast %cst_54 : f32 to vector<16x1xf32>
    %143 = arith.divf %141, %142 : vector<16x1xf32>
    %144 = vector.broadcast %143 : vector<16x1xf32> to vector<16x32xf32>
    %145 = arith.subf %139, %144 : vector<16x32xf32>
    %146 = arith.mulf %145, %145 : vector<16x32xf32>
    %cst_55 = arith.constant dense<0.000000e+00> : vector<16xf32>
    %147 = vector.multi_reduction <add>, %146, %cst_55 [1] : vector<16x32xf32> to vector<16xf32>
    %148 = vector.shape_cast %147 : vector<16xf32> to vector<16x1xf32>
    %cst_56 = arith.constant 3.200000e+01 : f32
    %149 = vector.broadcast %cst_56 : f32 to vector<16x1xf32>
    %150 = arith.divf %148, %149 : vector<16x1xf32>
    %151 = vector.broadcast %143 : vector<16x1xf32> to vector<16x32xf32>
    %152 = arith.subf %139, %151 : vector<16x32xf32>
    %cst_57 = arith.constant 9.99999974E-6 : f32
    %153 = vector.broadcast %cst_57 : f32 to vector<16x1xf32>
    %154 = arith.addf %150, %153 : vector<16x1xf32>
    %155 = math.rsqrt %154 : vector<16x1xf32>
    %156 = vector.broadcast %155 : vector<16x1xf32> to vector<16x32xf32>
    %157 = arith.mulf %152, %156 : vector<16x32xf32>
    %158 = vector.broadcast %14 : vector<1x32xf32> to vector<16x32xf32>
    %159 = arith.mulf %157, %158 : vector<16x32xf32>
    %160 = vector.broadcast %15 : vector<1x32xf32> to vector<16x32xf32>
    %161 = arith.addf %159, %160 : vector<16x32xf32>
    %162 = vector.shape_cast %161 : vector<16x32xf32> to vector<2x8x32xf32>
    %c0_58 = arith.constant 0 : index
    %c0_59 = arith.constant 0 : index
    %c0_60 = arith.constant 0 : index
    %163 = vector.load %arg9[%c0_58, %c0_59, %c0_60] : memref<2x8x32xf32, #tpu.memory_space<vmem>>, vector<2x8x32xf32>
    tpu.vector_store %arg9[%c0_58, %c0_59, %c0_60], %162 {strides = array<i32>} : memref<2x8x32xf32, #tpu.memory_space<vmem>>, vector<2x8x32xf32>,
    return
  }
  func.func @transform_0(%arg0: i32) -> (i32, i32, i32) {
    %c0_i32 = arith.constant 0 : i32
    %c0_i32_0 = arith.constant 0 : i32
    %c0_i32_1 = arith.constant 0 : i32
    return %arg0, %c0_i32, %c0_i32_0 : i32, i32, i32
  }
  func.func @transform_1(%arg0: i32) -> (i32, i32) {
    %c0_i32 = arith.constant 0 : i32
    %c0_i32_0 = arith.constant 0 : i32
    %c0_i32_1 = arith.constant 0 : i32
    return %c0_i32, %c0_i32_0 : i32, i32
  }
  func.func @transform_2(%arg0: i32) -> (i32, i32) {
    %c0_i32 = arith.constant 0 : i32
    %c0_i32_0 = arith.constant 0 : i32
    %c0_i32_1 = arith.constant 0 : i32
    return %c0_i32, %c0_i32_0 : i32, i32
  }
  func.func @transform_3(%arg0: i32) -> (i32, i32) {
    %c0_i32 = arith.constant 0 : i32
    %c0_i32_0 = arith.constant 0 : i32
    %c0_i32_1 = arith.constant 0 : i32
    return %c0_i32, %c0_i32_0 : i32, i32
  }
  func.func @transform_4(%arg0: i32) -> (i32, i32) {
    %c0_i32 = arith.constant 0 : i32
    %c0_i32_0 = arith.constant 0 : i32
    %c0_i32_1 = arith.constant 0 : i32
    return %c0_i32, %c0_i32_0 : i32, i32
  }
  func.func @transform_5(%arg0: i32) -> (i32, i32) {
    %c0_i32 = arith.constant 0 : i32
    %c0_i32_0 = arith.constant 0 : i32
    %c0_i32_1 = arith.constant 0 : i32
    return %c0_i32, %c0_i32_0 : i32, i32
  }
  func.func @transform_6(%arg0: i32) -> (i32, i32) {
    %c0_i32 = arith.constant 0 : i32
    %c0_i32_0 = arith.constant 0 : i32
    %c0_i32_1 = arith.constant 0 : i32
    return %c0_i32, %c0_i32_0 : i32, i32
  }
  func.func @transform_7(%arg0: i32) -> (i32, i32) {
    %c0_i32 = arith.constant 0 : i32
    %c0_i32_0 = arith.constant 0 : i32
    %c0_i32_1 = arith.constant 0 : i32
    return %c0_i32, %c0_i32_0 : i32, i32
  }
  func.func @transform_8(%arg0: i32) -> (i32, i32, i32) {
    %c0_i32 = arith.constant 0 : i32
    %c0_i32_0 = arith.constant 0 : i32
    %c0_i32_1 = arith.constant 0 : i32
    return %arg0, %c0_i32, %c0_i32_0 : i32, i32, i32
  }
}

</mosaic_0001>

<bundles_post_ra>
// kernel: tpu_custom_call.1
= control target key start
LH: loop header
LB: loop body
LE: loop exit
PB: predicated region body
PF: predicated region fallthrough
CT: control target
= control target key end

     0   :  { %13 = vsyncpa [#allocation4], 0  ;;  %s2007_s0 = inlined_call_operand.vmem [shape: f32[2,8,32], index: 0, kind: input, shape index: {}]   ;;  %s2008_s1 = inlined_call_operand.vmem [shape: bf16[32,96], index: 1, kind: input, shape index: {}]   ;;  %s2009_s2 = inlined_call_operand.vmem [shape: f32[1,96], index: 2, kind: input, shape index: {}]   ;;  %s2010_s3 = inlined_call_operand.vmem [shape: bf16[32,32], index: 3, kind: input, shape index: {}]   ;;  %s2011_s4 = inlined_call_operand.hbm [shape: bf16[32,64], index: 4, kind: input, shape index: {}]   ;;  %s2012_s5 = inlined_call_operand.vmem [shape: f32[1,64], index: 5, kind: input, shape index: {}]   ;;  %s2013_s6 = inlined_call_operand.vmem [shape: bf16[64,32], index: 6, kind: input, shape index: {}]   ;;  %s2014_s7 = inlined_call_operand.vmem [shape: f32[6,32], index: 7, kind: input, shape index: {}]   ;;  %s2015_s8 = inlined_call_operand.hbm [shape: f32[2,8,32], index: 8, kind: output, shape index: {}]  }
   0x1   :  { %14 = vsyncpa [#allocation5], 0  ;;  %s1681_s27 = smov [#allocation3]   ;;  %s1633_s9 = scalar_lea.hbm %s2011_s4, 256 }
   0x2   :  { %s28_s28 = sshll.u32 %s1681_s27, 4  ;;  %p1634_p0 = scmp.ne.s32.totalorder %s2011_s4, %s1633_s9  ;;  %s29_s28 = int_to_ptr.vmem [resolvable:$true] %s28_s28 }
   0x3   :  { %p1637_p1 = scmp.lt.u32.totalorder %s1633_s9, %s2011_s4 }
   0x5   :  { %p1639_p2 = pnand %p1637_p1, %p1634_p0 }
   0x7   :  { %1642 = shalt.err (!%p1639_p2)
}
   0x8   :  { %s1643_s14 = scalar_lea.vmem %s29_s28, 256  ;;  %p1648_p4 = scmp.lt.s32.totalorder %s29_s28, %s29_s28 }
   0x9   :  { %p1644_p3 = scmp.ne.s32.totalorder %s29_s28, %s1643_s14  ;;  %p1649_p5 = scmp.lt.s32.totalorder %s1643_s14, %s1643_s14 }
   0xb   :  { %p1650_p6 = por %p1649_p5, %p1648_p4 }
   0xd   :  { %p1651_p7 = pnand %p1650_p6, %p1644_p3 }
   0xf   :  { %1654 = shalt.err (!%p1651_p7)
}
  0x10   :  { %s1682_s15 = smov 64   ;;  %s1683_s16 = smov 4  }
  0x11   :  { %34 = dma.hbm_to_vmem [thread:$0]  %s2011_s4, 256, %s29_s28, [#allocation4], %s1682_s15, %s1682_s15, %s1683_s16  }
  0x12   :  { %1677 = dma.done.wait [#allocation4], 256  }
  0x13   :  { %1678 = vsyncadd [#allocation4], 4294967040  ;;  %v1684_v0 = vmov 0.0   ;;  %vm1685_vm0 = vmmov 0   ;;  %v1583_v1 = vld [vmem:[%s2008_s1] sm:$0xff]   ;;  %v1584_v2 = vld [vmem:[%s2008_s1 + $0x8] sm:$0xff]  }
  0x14   :  { %1431 = vmatprep.subr.bf16.mxu0 %v1684_v0  ;;  %1435 = vmatprep.mubr.msk.bf16.mxu0 %vm1685_vm0, %v1684_v0  ;;  %v1775_v3 = vld [vmem:[%s2007_s0] sm:$0xff]  ;;  %v1780_v4 = vld [vmem:[%s2007_s0 + $0x8] sm:$0xff]  ;;  %vm71_vm1 = vcmask 261120   ;;  %s1686_s0 = smov 96   ;;  %vm122_vm2 = vcmask 64512   ;;  %vm247_vm3 = vcmask 1043456  }
  0x15   :  { %1439 = vmatprep.subr.bf16.mxu1 %v1684_v0  ;;  %1441 = vmatprep.mubr.msk.bf16.mxu1 %vm1685_vm0, %v1684_v0  ;;  %v47_v5 = vpack.c.bf16 %v1780_v4, %v1775_v3  ;;  %v1353_v6 = vld [vmem:[%s2009_s2] ss:$0 sm:$0xff]  ;;  %s1687_s2 = smov 88   ;;  %s1688_s27 = smov 120   ;;  %vm569_vm4 = vcmask 130112   ;;  %vm800_vm5 = vcmask 195712  }
  0x16   :  { %1432 = vmatpush3.bf16.msra.mxu0 %v1583_v1  ;;  %s1689_s28 = smov 56   ;;  %s1690_s29 = smov 80   ;;  %vm1031_vm6 = vcmask 261312   ;;  %vm1249_vm7 = vcmask 523264  }
  0x17   :  { %1433 = vmatprep.subr.bf16.mxu0 %v1684_v0  ;;  %s1691_s30 = smov 112   ;;  %s1692_s9 = smov 48  }
  0x18   :  { %s1693_s10 = smov 72   ;;  %s1694_s11 = smov 104  }
  0x19   :  { %s1695_s12 = smov 40   ;;  %s1696_s13 = smov 8  }
  0x1a   :  { %1434 = vmatpush3.bf16.msra.mxu0 %v1584_v2  ;;  %s1697_s14 = smov 16   ;;  %s1698_s19 = smov 24  }
  0x1b   :  { %1445 = vmatprep.subr.bf16.mxu0 %v1684_v0 }
  0x1d   :  { %1436 = vmatmul.mubr.msk.bf16.vlgmr.msra.gmra.mrb[0].mxu0 %vm71_vm1, %v47_v5 }
  0x1e   :  { %1447 = vmatprep.mubr.msk.bf16.mxu0 %vm1685_vm0, %v1684_v0 }
  0xf0   :  { %v109_v7 = vpop.f32.mrb[0].mxu0 }
  0xf1   :  { %v110_v8 = vadd.f32 %v1353_v6, %v109_v7  ;;  %v1437_v9 = vpop.f32.mrb[1].mxu0 }
  0xf2   :  { %v112_v10 = vpop.f32.mrb[2].mxu0 }
  0xf3   :  { %v1792_v11 = vpack.c.bf16 %v110_v8, %v110_v8  ;;  %v113_v12 = vadd.f32 %v1353_v6, %v112_v10  ;;  %v1438_v13 = vpop.f32.mrb[3].mxu0 }
  0xf5   :  { %120 = vrot.lane.b32.xlu0 %v1792_v11, %s1686_s0  ;;  %v1795_v14 = vpack.c.bf16 %v113_v12, %v113_v12 }
  0xf9   :  { %170 = vrot.lane.b32.xlu0 %v1795_v14, %s1686_s0 }
 0x167   :  { %v121_v15 = vpop.permute.xlu0 %120 }
 0x168   :  { %v127_v16 = vsel %vm122_vm2, %v121_v15, 0 }
 0x169   :  { %1440 = vmatpush3.bf16.xpose.msra.mxu1 %v127_v16 }
 0x16a   :  { %1451 = vmatprep.subr.bf16.mxu1 %v1684_v0 }
 0x16b   :  { %v171_v17 = vpop.permute.xlu0 %170 }
 0x16c   :  { %v176_v18 = vsel %vm122_vm2, %v171_v17, 0 }
 0x16d   :  { %1446 = vmatpush3.bf16.xpose.msra.mxu0 %v176_v18 }
 0x16e   :  { %1457 = vmatprep.subr.bf16.mxu0 %v1684_v0 }
 0x170   :  { %1442 = vmatmul.mubr.msk.bf16.vlgmr.msra.gmra.mrb[0].mxu1 %vm122_vm2, %v1792_v11 }
 0x171   :  { %1453 = vmatprep.mubr.msk.bf16.mxu1 %vm1685_vm0, %v1684_v0 }
 0x174   :  { %1448 = vmatmul.mubr.msk.bf16.vlgmr.msra.gmra.mrb[4].mxu0 %vm122_vm2, %v1795_v14 }
 0x175   :  { %1459 = vmatprep.mubr.msk.bf16.mxu0 %vm1685_vm0, %v1684_v0 }
 0x243   :  { %v163_v19 = vpop.f32.mrb[0].mxu1 }
 0x244   :  { %v1443_v20 = vpop.f32.mrb[1].mxu1  ;;  %v218_v21 = vsel %vm122_vm2, %v163_v19, -inf }
 0x245   :  { %219 = vmax.xlane.f32.xlu1 %v218_v21  ;;  %v166_v22 = vpop.f32.mrb[2].mxu1 }
 0x246   :  { %v1444_v23 = vpop.f32.mrb[3].mxu1 }
 0x247   :  { %v212_v24 = vpop.f32.mrb[4].mxu0 }
 0x248   :  { %v1449_v25 = vpop.f32.mrb[5].mxu0  ;;  %v221_v26 = vsel %vm122_vm2, %v212_v24, -inf }
 0x249   :  { %222 = vmax.xlane.f32.xlu1 %v221_v26  ;;  %v215_v27 = vpop.f32.mrb[6].mxu0 }
 0x24a   :  { %v1450_v28 = vpop.f32.mrb[7].mxu0 }
 0x25a   :  { %242 = vrot.lane.b32.xlu1 %v1792_v11, %s1682_s15 }
 0x25e   :  { %291 = vrot.lane.b32.xlu1 %v1795_v14, %s1682_s15 }
 0x262   :  { %343 = vrot.lane.b32.xlu1 %v1792_v11, %s1687_s2 }
 0x2d2   :  { %v220_v29 = vpop.xlane.xlu1 %219 }
 0x2d3   :  { %v224_v30 = vsub.f32 %v163_v19, %v220_v29 }
 0x2d5   :  { %v226_v31 = vmul.f32 1.442695, %v224_v30 }
 0x2d6   :  { %v223_v32 = vpop.xlane.xlu1 %222 }
 0x2d7   :  { %1593 = vpow2.f32 %v226_v31  ;;  %v225_v33 = vsub.f32 %v212_v24, %v223_v32 }
 0x2d9   :  { %v228_v34 = vmul.f32 1.442695, %v225_v33 }
 0x2da   :  { %v243_v35 = vpop.permute.xlu1 %242 }
 0x2db   :  { %1595 = vpow2.f32 %v228_v34  ;;  %v249_v36 = vsel %vm247_vm3, %v243_v35, 0 }
 0x2dc   :  { %1452 = vmatpush3.bf16.msra.mxu1 %v249_v36 }
 0x2dd   :  { %1463 = vmatprep.subr.bf16.mxu1 %v1684_v0 }
 0x2de   :  { %v292_v37 = vpop.permute.xlu1 %291 }
 0x2df   :  { %v297_v38 = vsel %vm247_vm3, %v292_v37, 0 }
 0x2e0   :  { %1458 = vmatpush3.bf16.msra.mxu0 %v297_v38 }
 0x2e1   :  { %v1594_v39 = vpop.eup %1593  ;;  %1469 = vmatprep.subr.bf16.mxu0 %v1684_v0 }
 0x2e2   :  { %v230_v40 = vsel %vm122_vm2, %v1594_v39, 0.0  ;;  %v344_v43 = vpop.permute.xlu1 %343 }
 0x2e3   :  { %231 = vadd.xlane.f32.xlu0 %v230_v40  ;;  %v349_v50 = vsel %vm122_vm2, %v344_v43, 0 }
 0x2e5   :  { %v1596_v41 = vpop.eup %1595 }
 0x2e6   :  { %v233_v42 = vsel %vm122_vm2, %v1596_v41, 0.0 }
 0x2e7   :  { %234 = vadd.xlane.f32.xlu1 %v233_v42 }
 0x2f8   :  { %393 = vrot.lane.b32.xlu1 %v1795_v14, %s1687_s2 }
 0x2f9   :  { %341 = vrot.lane.b32.xlu0 %v1792_v11, %s1688_s27 }
 0x2fc   :  { %391 = vrot.lane.b32.xlu1 %v1795_v14, %s1688_s27 }
 0x370   :  { %v232_v44 = vpop.xlane.xlu0 %231 }
 0x371   :  { %1597 = vrcp.f32 %v232_v44 }
 0x374   :  { %v235_v45 = vpop.xlane.xlu1 %234  ;;  %v342_v55 = vpop.permute.xlu0 %341 }
 0x375   :  { %1599 = vrcp.f32 %v235_v45 }
 0x378   :  { %v394_v52 = vpop.permute.xlu1 %393 }
 0x379   :  { %v399_v54 = vsel %vm122_vm2, %v394_v52, 0 }
 0x37b   :  { %v1598_v46 = vpop.eup %1597 }
 0x37c   :  { %v238_v47 = vmul.f32 %v1598_v46, %v1594_v39  ;;  %v392_v56 = vpop.permute.xlu1 %391 }
 0x37e   :  { %v240_v48 = vpack.c.bf16 %v238_v47, %v238_v47 }
 0x37f   :  { %v1600_v49 = vpop.eup %1599 }
 0x380   :  { %v239_v51 = vmul.f32 %v1600_v49, %v1596_v41  ;;  %1454 = vmatmul.mubr.msk.bf16.vlgmr.msra.gmra.mrb[4].mxu1 %vm122_vm2, %v240_v48 }
 0x381   :  { %1464 = vmatpush3.bf16.xpose.msra.mxu1 %v349_v50  ;;  %1465 = vmatprep.mubr.msk.bf16.mxu1 %vm1685_vm0, %v1684_v0 }
 0x382   :  { %v241_v53 = vpack.c.bf16 %v239_v51, %v239_v51  ;;  %1475 = vmatprep.subr.bf16.mxu1 %v1684_v0 }
 0x384   :  { %1460 = vmatmul.mubr.msk.bf16.vlgmr.msra.gmra.mrb[8].mxu0 %vm122_vm2, %v241_v53 }
 0x385   :  { %1470 = vmatpush3.bf16.xpose.msra.mxu0 %v399_v54  ;;  %1471 = vmatprep.mubr.msk.bf16.mxu0 %vm1685_vm0, %v1684_v0 }
 0x386   :  { %1481 = vmatprep.subr.bf16.mxu0 %v1684_v0 }
 0x388   :  { %1466 = vmatmul.mubr.msk.bf16.vlgmr.msra.gmra.mrb[8].mxu1 %vm122_vm2, %v342_v55 }
 0x389   :  { %1477 = vmatprep.mubr.msk.bf16.mxu1 %vm1685_vm0, %v1684_v0 }
 0x38c   :  { %1472 = vmatmul.mubr.msk.bf16.vlgmr.msra.gmra.mrb[12].mxu0 %vm122_vm2, %v392_v56 }
 0x38d   :  { %1483 = vmatprep.mubr.msk.bf16.mxu0 %vm1685_vm0, %v1684_v0 }
 0x453   :  { %v285_v57 = vpop.f32.mrb[4].mxu1 }
 0x454   :  { %339 = vst.msk [vmem:[#allocation2] sm:$0xff] %vm122_vm2, %v285_v57  ;;  %v1455_v58 = vpop.f32.mrb[5].mxu1 }
 0x455   :  { %v288_v59 = vpop.f32.mrb[6].mxu1 }
 0x456   :  { %v1456_v60 = vpop.f32.mrb[7].mxu1 }
 0x457   :  { %v333_v61 = vpop.f32.mrb[8].mxu0 }
 0x458   :  { %340 = vst.msk [vmem:[#allocation2 + $0x8] sm:$0xff] %vm122_vm2, %v333_v61  ;;  %v1461_v62 = vpop.f32.mrb[9].mxu0 }
 0x459   :  { %v336_v63 = vpop.f32.mrb[10].mxu0 }
 0x45a   :  { %v1462_v1 = vpop.f32.mrb[11].mxu0 }
 0x45b   :  { %v385_v2 = vpop.f32.mrb[8].mxu1 }
 0x45c   :  { %v1467_v5 = vpop.f32.mrb[9].mxu1  ;;  %v441_v6 = vsel %vm122_vm2, %v385_v2, -inf }
 0x45d   :  { %442 = vmax.xlane.f32.xlu1 %v441_v6  ;;  %v388_v7 = vpop.f32.mrb[10].mxu1 }
 0x45e   :  { %v1468_v8 = vpop.f32.mrb[11].mxu1 }
 0x45f   :  { %v435_v9 = vpop.f32.mrb[12].mxu0 }
 0x460   :  { %v1473_v10 = vpop.f32.mrb[13].mxu0  ;;  %v444_v12 = vsel %vm122_vm2, %v435_v9, -inf }
 0x461   :  { %445 = vmax.xlane.f32.xlu0 %v444_v12  ;;  %v438_v13 = vpop.f32.mrb[14].mxu0 }
 0x462   :  { %v1474_v15 = vpop.f32.mrb[15].mxu0 }
 0x46e   :  { %465 = vrot.lane.b32.xlu1 %v1792_v11, %s1689_s28 }
 0x472   :  { %574 = vrot.lane.b32.xlu1 %v1792_v11, %s1690_s29 }
 0x477   :  { %513 = vrot.lane.b32.xlu0 %v1795_v14, %s1689_s28 }
 0x47b   :  { %572 = vrot.lane.b32.xlu0 %v1792_v11, %s1691_s30 }
 0x4ea   :  { %v443_v16 = vpop.xlane.xlu1 %442 }
 0x4eb   :  { %v447_v17 = vsub.f32 %v385_v2, %v443_v16 }
 0x4ed   :  { %v449_v18 = vmul.f32 1.442695, %v447_v17 }
 0x4ee   :  { %v466_v19 = vpop.permute.xlu1 %465  ;;  %v446_v20 = vpop.xlane.xlu0 %445 }
 0x4ef   :  { %1601 = vpow2.f32 %v449_v18  ;;  %v471_v21 = vsel %vm247_vm3, %v466_v19, 0  ;;  %v448_v22 = vsub.f32 %v435_v9, %v446_v20 }
 0x4f0   :  { %1476 = vmatpush3.bf16.msra.mxu1 %v471_v21 }
 0x4f1   :  { %v451_v23 = vmul.f32 1.442695, %v448_v22  ;;  %1487 = vmatprep.subr.bf16.mxu1 %v1684_v0 }
 0x4f2   :  { %v514_v24 = vpop.permute.xlu0 %513  ;;  %v575_v30 = vpop.permute.xlu1 %574 }
 0x4f3   :  { %1603 = vpow2.f32 %v451_v23  ;;  %v519_v25 = vsel %vm247_vm3, %v514_v24, 0  ;;  %v580_v37 = vsel %vm122_vm2, %v575_v30, 0 }
 0x4f4   :  { %1482 = vmatpush3.bf16.msra.mxu0 %v519_v25 }
 0x4f5   :  { %1493 = vmatprep.subr.bf16.mxu0 %v1684_v0 }
 0x4f6   :  { %v573_v42 = vpop.permute.xlu0 %572 }
 0x4f9   :  { %v1602_v26 = vpop.eup %1601 }
 0x4fa   :  { %v453_v27 = vsel %vm122_vm2, %v1602_v26, 0.0 }
 0x4fb   :  { %454 = vadd.xlane.f32.xlu1 %v453_v27 }
 0x4fd   :  { %v1604_v28 = vpop.eup %1603 }
 0x4fe   :  { %v456_v29 = vsel %vm122_vm2, %v1604_v28, 0.0 }
 0x4ff   :  { %457 = vadd.xlane.f32.xlu1 %v456_v29 }
 0x510   :  { %624 = vrot.lane.b32.xlu1 %v1795_v14, %s1690_s29 }
 0x514   :  { %622 = vrot.lane.b32.xlu1 %v1795_v14, %s1691_s30 }
 0x588   :  { %v455_v31 = vpop.xlane.xlu1 %454 }
 0x589   :  { %1605 = vrcp.f32 %v455_v31 }
 0x58c   :  { %v458_v32 = vpop.xlane.xlu1 %457 }
 0x58d   :  { %1607 = vrcp.f32 %v458_v32 }
 0x590   :  { %v625_v39 = vpop.permute.xlu1 %624 }
 0x591   :  { %v630_v41 = vsel %vm122_vm2, %v625_v39, 0 }
 0x593   :  { %v1606_v33 = vpop.eup %1605 }
 0x594   :  { %v461_v34 = vmul.f32 %v1606_v33, %v1602_v26  ;;  %v623_v43 = vpop.permute.xlu1 %622 }
 0x596   :  { %v463_v35 = vpack.c.bf16 %v461_v34, %v461_v34 }
 0x597   :  { %v1608_v36 = vpop.eup %1607 }
 0x598   :  { %v462_v38 = vmul.f32 %v1608_v36, %v1604_v28  ;;  %1478 = vmatmul.mubr.msk.bf16.vlgmr.msra.gmra.mrb[12].mxu1 %vm122_vm2, %v463_v35 }
 0x599   :  { %1488 = vmatpush3.bf16.xpose.msra.mxu1 %v580_v37  ;;  %1489 = vmatprep.mubr.msk.bf16.mxu1 %vm1685_vm0, %v1684_v0 }
 0x59a   :  { %v464_v40 = vpack.c.bf16 %v462_v38, %v462_v38  ;;  %1499 = vmatprep.subr.bf16.mxu1 %v1684_v0 }
 0x59c   :  { %1484 = vmatmul.mubr.msk.bf16.vlgmr.msra.gmra.mrb[16].mxu0 %vm122_vm2, %v464_v40 }
 0x59d   :  { %1494 = vmatpush3.bf16.xpose.msra.mxu0 %v630_v41  ;;  %1495 = vmatprep.mubr.msk.bf16.mxu0 %vm1685_vm0, %v1684_v0 }
 0x59e   :  { %1505 = vmatprep.subr.bf16.mxu0 %v1684_v0 }
 0x5a0   :  { %1490 = vmatmul.mubr.msk.bf16.vlgmr.msra.gmra.mrb[16].mxu1 %vm122_vm2, %v573_v42 }
 0x5a1   :  { %1501 = vmatprep.mubr.msk.bf16.mxu1 %vm1685_vm0, %v1684_v0 }
 0x5a4   :  { %1496 = vmatmul.mubr.msk.bf16.vlgmr.msra.gmra.mrb[20].mxu0 %vm122_vm2, %v623_v43 }
 0x5a5   :  { %1507 = vmatprep.mubr.msk.bf16.mxu0 %vm1685_vm0, %v1684_v0 }
 0x66b   :  { %v1874_v44 = vpop.f32.mrb[12].mxu1 }
 0x66c   :  { %v1479_v45 = vpop.f32.mrb[13].mxu1 }
 0x66d   :  { %v510_v46 = vpop.f32.mrb[14].mxu1 }
 0x66e   :  { %v1480_v47 = vpop.f32.mrb[15].mxu1 }
 0x66f   :  { %v1876_v48 = vpop.f32.mrb[16].mxu0 }
 0x670   :  { %v1485_v49 = vpop.f32.mrb[17].mxu0 }
 0x671   :  { %v558_v50 = vpop.f32.mrb[18].mxu0 }
 0x672   :  { %v1486_v51 = vpop.f32.mrb[19].mxu0 }
 0x673   :  { %v616_v52 = vpop.f32.mrb[16].mxu1 }
 0x674   :  { %v1491_v53 = vpop.f32.mrb[17].mxu1  ;;  %v672_v54 = vsel %vm122_vm2, %v616_v52, -inf }
 0x675   :  { %673 = vmax.xlane.f32.xlu0 %v672_v54  ;;  %v619_v55 = vpop.f32.mrb[18].mxu1 }
 0x676   :  { %v1492_v56 = vpop.f32.mrb[19].mxu1 }
 0x677   :  { %v666_v57 = vpop.f32.mrb[20].mxu0 }
 0x678   :  { %v1497_v58 = vpop.f32.mrb[21].mxu0  ;;  %v675_v59 = vsel %vm122_vm2, %v666_v57, -inf }
 0x679   :  { %676 = vmax.xlane.f32.xlu1 %v675_v59  ;;  %v669_v60 = vpop.f32.mrb[22].mxu0 }
 0x67a   :  { %v1498_v61 = vpop.f32.mrb[23].mxu0 }
 0x68a   :  { %696 = vrot.lane.b32.xlu1 %v1792_v11, %s1692_s9 }
 0x68e   :  { %805 = vrot.lane.b32.xlu1 %v1792_v11, %s1693_s10 }
 0x692   :  { %855 = vrot.lane.b32.xlu1 %v1795_v14, %s1693_s10 }
 0x696   :  { %853 = vrot.lane.b32.xlu1 %v1795_v14, %s1694_s11 }
 0x702   :  { %v674_v62 = vpop.xlane.xlu0 %673 }
 0x703   :  { %v678_v63 = vsub.f32 %v616_v52, %v674_v62 }
 0x705   :  { %v680_v1 = vmul.f32 1.442695, %v678_v63 }
 0x706   :  { %v677_v2 = vpop.xlane.xlu1 %676 }
 0x707   :  { %1609 = vpow2.f32 %v680_v1  ;;  %v679_v5 = vsub.f32 %v666_v57, %v677_v2 }
 0x709   :  { %v682_v6 = vmul.f32 1.442695, %v679_v5 }
 0x70a   :  { %v697_v7 = vpop.permute.xlu1 %696 }
 0x70b   :  { %1611 = vpow2.f32 %v682_v6  ;;  %v702_v8 = vsel %vm247_vm3, %v697_v7, 0 }
 0x70c   :  { %1500 = vmatpush3.bf16.msra.mxu1 %v702_v8 }
 0x70d   :  { %1511 = vmatprep.subr.bf16.mxu1 %v1684_v0 }
 0x70e   :  { %v806_v20 = vpop.permute.xlu1 %805 }
 0x70f   :  { %v811_v24 = vsel %vm122_vm2, %v806_v20, 0 }
 0x711   :  { %v1610_v9 = vpop.eup %1609 }
 0x712   :  { %v684_v10 = vsel %vm122_vm2, %v1610_v9, 0.0  ;;  %v856_v26 = vpop.permute.xlu1 %855 }
 0x713   :  { %685 = vadd.xlane.f32.xlu0 %v684_v10  ;;  %v861_v28 = vsel %vm122_vm2, %v856_v26, 0 }
 0x715   :  { %v1612_v12 = vpop.eup %1611 }
 0x716   :  { %v687_v13 = vsel %vm122_vm2, %v1612_v12, 0.0  ;;  %v854_v30 = vpop.permute.xlu1 %853 }
 0x717   :  { %688 = vadd.xlane.f32.xlu0 %v687_v13  ;;  %v1585_v13 = vld [vmem:[%s2010_s3] sm:$0xff]  }
 0x72d   :  { %744 = vrot.lane.b32.xlu0 %v1795_v14, %s1692_s9 }
 0x731   :  { %803 = vrot.lane.b32.xlu0 %v1792_v11, %s1694_s11 }
 0x7a0   :  { %v686_v15 = vpop.xlane.xlu0 %685 }
 0x7a1   :  { %1613 = vrcp.f32 %v686_v15  ;;  %v1586_v15 = vld [vmem:[%s2010_s3 + $0x8] sm:$0xff]  }
 0x7a4   :  { %v689_v16 = vpop.xlane.xlu0 %688 }
 0x7a5   :  { %1615 = vrcp.f32 %v689_v16 }
 0x7a8   :  { %v745_v17 = vpop.permute.xlu0 %744 }
 0x7a9   :  { %v750_v18 = vsel %vm247_vm3, %v745_v17, 0 }
 0x7aa   :  { %1506 = vmatpush3.bf16.msra.mxu0 %v750_v18 }
 0x7ab   :  { %v1614_v19 = vpop.eup %1613  ;;  %1517 = vmatprep.subr.bf16.mxu0 %v1684_v0 }
 0x7ac   :  { %v692_v21 = vmul.f32 %v1614_v19, %v1610_v9  ;;  %v804_v29 = vpop.permute.xlu0 %803 }
 0x7ae   :  { %v694_v22 = vpack.c.bf16 %v692_v21, %v692_v21 }
 0x7af   :  { %v1616_v23 = vpop.eup %1615 }
 0x7b0   :  { %v693_v25 = vmul.f32 %v1616_v23, %v1612_v12  ;;  %1502 = vmatmul.mubr.msk.bf16.vlgmr.msra.gmra.mrb[20].mxu1 %vm122_vm2, %v694_v22 }
 0x7b1   :  { %1512 = vmatpush3.bf16.xpose.msra.mxu1 %v811_v24  ;;  %1513 = vmatprep.mubr.msk.bf16.mxu1 %vm1685_vm0, %v1684_v0 }
 0x7b2   :  { %v695_v27 = vpack.c.bf16 %v693_v25, %v693_v25  ;;  %1523 = vmatprep.subr.bf16.mxu1 %v1684_v0 }
 0x7b4   :  { %1508 = vmatmul.mubr.msk.bf16.vlgmr.msra.gmra.mrb[24].mxu0 %vm122_vm2, %v695_v27 }
 0x7b5   :  { %1518 = vmatpush3.bf16.xpose.msra.mxu0 %v861_v28  ;;  %1519 = vmatprep.mubr.msk.bf16.mxu0 %vm1685_vm0, %v1684_v0 }
 0x7b6   :  { %1529 = vmatprep.subr.bf16.mxu0 %v1684_v0 }
 0x7b8   :  { %1514 = vmatmul.mubr.msk.bf16.vlgmr.msra.gmra.mrb[24].mxu1 %vm122_vm2, %v804_v29  ;;  %v1041_v29 = vlaneseq }
 0x7b9   :  { %1525 = vmatprep.mubr.msk.bf16.mxu1 %vm1685_vm0, %v1684_v0 }
 0x7bc   :  { %1520 = vmatmul.mubr.msk.bf16.vlgmr.msra.gmra.mrb[28].mxu0 %vm122_vm2, %v854_v30  ;;  %v1943_v30 = vshrl.u32 %v1041_v29, 7 }
 0x7bd   :  { %1531 = vmatprep.mubr.msk.bf16.mxu0 %vm1685_vm0, %v1684_v0 }
 0x883   :  { %v738_v31 = vpop.f32.mrb[20].mxu1 }
 0x884   :  { %v1503_v32 = vpop.f32.mrb[21].mxu1 }
 0x885   :  { %v741_v33 = vpop.f32.mrb[22].mxu1  ;;  %v1949_v32 = vld [vmem:[%s2014_s7] sm:$0x3f] }
 0x886   :  { %v1504_v34 = vpop.f32.mrb[23].mxu1 }
 0x887   :  { %v786_v35 = vpop.f32.mrb[24].mxu0 }
 0x888   :  { %v1509_v36 = vpop.f32.mrb[25].mxu0 }
 0x889   :  { %v789_v37 = vpop.f32.mrb[26].mxu0 }
 0x88a   :  { %v1510_v38 = vpop.f32.mrb[27].mxu0 }
 0x88b   :  { %v847_v39 = vpop.f32.mrb[24].mxu1 }
 0x88c   :  { %v1515_v40 = vpop.f32.mrb[25].mxu1  ;;  %v903_v41 = vsel %vm122_vm2, %v847_v39, -inf }
 0x88d   :  { %904 = vmax.xlane.f32.xlu0 %v903_v41  ;;  %v850_v42 = vpop.f32.mrb[26].mxu1 }
 0x88e   :  { %v1516_v43 = vpop.f32.mrb[27].mxu1 }
 0x88f   :  { %v897_v45 = vpop.f32.mrb[28].mxu0 }
 0x890   :  { %v1521_v46 = vpop.f32.mrb[29].mxu0  ;;  %v906_v47 = vsel %vm122_vm2, %v897_v45, -inf }
 0x891   :  { %907 = vmax.xlane.f32.xlu1 %v906_v47  ;;  %v900_v49 = vpop.f32.mrb[30].mxu0 }
 0x892   :  { %v1522_v50 = vpop.f32.mrb[31].mxu0 }
 0x8a2   :  { %927 = vrot.lane.b32.xlu1 %v1792_v11, %s1695_s12 }
 0x8a6   :  { %563 = vrot.lane.b32.xlu1 %v1874_v44, %s1696_s13 }
 0x8aa   :  { %565 = vrot.lane.b32.xlu1 %v1876_v48, %s1696_s13 }
 0x8ae   :  { %796 = vrot.lane.b32.xlu1 %v786_v35, %s1697_s14 }
 0x91a   :  { %v905_v51 = vpop.xlane.xlu0 %904 }
 0x91b   :  { %v909_v52 = vsub.f32 %v847_v39, %v905_v51 }
 0x91d   :  { %v911_v53 = vmul.f32 1.442695, %v909_v52 }
 0x91e   :  { %v908_v54 = vpop.xlane.xlu1 %907 }
 0x91f   :  { %1617 = vpow2.f32 %v911_v53  ;;  %v910_v55 = vsub.f32 %v897_v45, %v908_v54 }
 0x921   :  { %v913_v56 = vmul.f32 1.442695, %v910_v55  ;;  %v1587_v55 = vld [vmem:[#allocation3] sm:$0xff]  }
 0x922   :  { %v928_v57 = vpop.permute.xlu1 %927 }
 0x923   :  { %1619 = vpow2.f32 %v913_v56  ;;  %v933_v11 = vsel %vm247_vm3, %v928_v57, 0  ;;  %v1589_v56 = vld [vmem:[%s2013_s6] sm:$0xff]   ;;  %v1590_v57 = vld [vmem:[%s2013_s6 + $0x8] sm:$0xff]  }
 0x924   :  { %1524 = vmatpush3.bf16.msra.mxu1 %v933_v11 }
 0x925   :  { %1535 = vmatprep.subr.bf16.mxu1 %v1684_v0 }
 0x926   :  { %v564_v44 = vpop.permute.xlu1 %563 }
 0x927   :  { %570 = vst.msk [vmem:[#allocation2] sm:$0xff] %vm569_vm4, %v564_v44 }
 0x929   :  { %v1618_v48 = vpop.eup %1617 }
 0x92a   :  { %v566_v58 = vpop.permute.xlu1 %565  ;;  %v915_v59 = vsel %vm122_vm2, %v1618_v48, 0.0 }
 0x92b   :  { %571 = vst.msk [vmem:[#allocation2 + $0x8] sm:$0xff] %vm569_vm4, %v566_v58  ;;  %916 = vadd.xlane.f32.xlu0 %v915_v59 }
 0x92d   :  { %v1620_v60 = vpop.eup %1619 }
 0x92e   :  { %v797_v61 = vpop.permute.xlu1 %796  ;;  %v918_v62 = vsel %vm122_vm2, %v1620_v60, 0.0 }
 0x92f   :  { %802 = vst.msk [vmem:[#allocation2 + $0x8] sm:$0xff] %vm800_vm5, %v797_v61  ;;  %919 = vadd.xlane.f32.xlu0 %v918_v62  ;;  %v1132_v61 = vsub.s32 1, %v1943_v30 }
 0x945   :  { %975 = vrot.lane.b32.xlu0 %v1795_v14, %s1695_s12 }
 0x949   :  { %794 = vrot.lane.b32.xlu0 %v738_v31, %s1697_s14  ;;  %v1043_v31 = vsub.s32 0, %v1943_v30 }
 0x94b   :  { %v1044_v33 = vrot.slane %v1949_v32, %v1043_v31 }
 0x9b8   :  { %v917_v63 = vpop.xlane.xlu0 %916 }
 0x9b9   :  { %1621 = vrcp.f32 %v917_v63  ;;  %v1133_v63 = vrot.slane %v1949_v32, %v1132_v61 }
 0x9bc   :  { %v920_v1 = vpop.xlane.xlu0 %919 }
 0x9bd   :  { %1623 = vrcp.f32 %v920_v1 }
 0x9c0   :  { %v976_v2 = vpop.permute.xlu0 %975 }
 0x9c1   :  { %v981_v5 = vsel %vm247_vm3, %v976_v2, 0  ;;  %v1138_v2 = vsub.s32 2, %v1943_v30 }
 0x9c2   :  { %1530 = vmatpush3.bf16.msra.mxu0 %v981_v5 }
 0x9c3   :  { %v1622_v6 = vpop.eup %1621  ;;  %1543 = vmatprep.subr.bf16.mxu0 %v1684_v0 }
 0x9c4   :  { %v923_v7 = vmul.f32 %v1622_v6, %v1618_v48  ;;  %v795_v8 = vpop.permute.xlu0 %794 }
 0x9c5   :  { %801 = vst.msk [vmem:[#allocation2] sm:$0xff] %vm800_vm5, %v795_v8  ;;  %v1139_v8 = vrot.slane %v1949_v32, %v1138_v2 }
 0x9c6   :  { %v925_v9 = vpack.c.bf16 %v923_v7, %v923_v7 }
 0x9c7   :  { %v1624_v10 = vpop.eup %1623 }
 0x9c8   :  { %v924_v12 = vmul.f32 %v1624_v10, %v1620_v60  ;;  %1526 = vmatmul.mubr.msk.bf16.vlgmr.msra.gmra.mrb[28].mxu1 %vm122_vm2, %v925_v9 }
 0x9c9   :  { %1539 = vmatprep.mubr.msk.bf16.mxu1 %vm1685_vm0, %v1684_v0  ;;  %1536 = vmatpush3.bf16.msra.mxu1 %v1585_v13  ;;  %v1591_v13 = vld [vmem:[%s2013_s6 + $0x10] sm:$0xff]  }
 0x9ca   :  { %v926_v14 = vpack.c.bf16 %v924_v12, %v924_v12  ;;  %1537 = vmatprep.subr.bf16.mxu1 %v1684_v0 }
 0x9cc   :  { %1532 = vmatmul.mubr.msk.bf16.vlgmr.msra.gmra.mrb[32].mxu0 %vm122_vm2, %v926_v14 }
 0x9cd   :  { %1547 = vmatprep.mubr.msk.bf16.mxu0 %vm1685_vm0, %v1684_v0  ;;  %1538 = vmatpush3.bf16.msra.mxu1 %v1586_v15  ;;  %v1592_v15 = vld [vmem:[%s2013_s6 + $0x18] sm:$0xff]  }
 0x9ce   :  { %1551 = vmatprep.subr.bf16.mxu1 %v1684_v0  ;;  %1544 = vmatpush3.bf16.msra.mxu0 %v1587_v55 }
 0x9cf   :  { %1545 = vmatprep.subr.bf16.mxu0 %v1684_v0 }
 0xa9b   :  { %v969_v16 = vpop.f32.mrb[28].mxu1 }
 0xa9c   :  { %1025 = vrot.lane.b32.xlu0 %v969_v16, %s1698_s19  ;;  %v1527_v17 = vpop.f32.mrb[29].mxu1  ;;  %v1376_v16 = vld [vmem:[%s2012_s5] ss:$0 sm:$0xff]  ;;  %s1699_s5 = smov [#allocation6]  }
 0xa9d   :  { %v972_v18 = vpop.f32.mrb[30].mxu1  ;;  %s1341_s6 = sshll.u32 %s1699_s5, 4  ;;  %s1342_s6 = int_to_ptr.vmem [resolvable:$true] %s1341_s6 }
 0xa9e   :  { %v1528_v19 = vpop.f32.mrb[31].mxu1  ;;  %s1655_s2 = scalar_lea.vmem %s1342_s6, 256  ;;  %p1660_p9 = scmp.lt.s32.totalorder %s1342_s6, %s1342_s6 }
 0xa9f   :  { %v1017_v20 = vpop.f32.mrb[32].mxu0  ;;  %p1656_p8 = scmp.ne.s32.totalorder %s1342_s6, %s1655_s2  ;;  %p1661_p10 = scmp.lt.s32.totalorder %s1655_s2, %s1655_s2 }
 0xaa0   :  { %1027 = vrot.lane.b32.xlu1 %v1017_v20, %s1698_s19  ;;  %v1533_v21 = vpop.f32.mrb[33].mxu0 }
 0xaa1   :  { %v1020_v22 = vpop.f32.mrb[34].mxu0  ;;  %p1662_p11 = por %p1661_p10, %p1660_p9 }
 0xaa2   :  { %v1534_v23 = vpop.f32.mrb[35].mxu0 }
 0xaa3   :  { %p1663_p12 = pnand %p1662_p11, %p1656_p8 }
 0xb0e   :  { %v1026_v24 = vpop.permute.xlu0 %1025 }
 0xb0f   :  { %1032 = vst.msk [vmem:[#allocation2] sm:$0xff] %vm1031_vm6, %v1026_v24 }
 0xb12   :  { %v1028_v25 = vpop.permute.xlu1 %1027 }
 0xb13   :  { %1033 = vst.msk [vmem:[#allocation2 + $0x8] sm:$0xff] %vm1031_vm6, %v1028_v25 }
 0xb16   :  { %v1034_v26 = vld [vmem:[#allocation2] sm:$0xff] }
 0xb1a   :  { %v1035_v27 = vld [vmem:[#allocation2 + $0x8] sm:$0xff] }
 0xb1b   :  { %v1036_v28 = vpack.c.bf16 %v1035_v27, %v1034_v26 }
 0xb1d   :  { %1540 = vmatmul.mubr.msk.bf16.vlgmr.msra.gmra.mrb[32].mxu1 %vm71_vm1, %v1036_v28 }
 0xb1e   :  { %1559 = vmatprep.mubr.msk.bf16.mxu1 %vm1685_vm0, %v1684_v0  ;;  %1552 = vmatpush3.bf16.msra.mxu1 %v1589_v56  ;;  %v1330_v56 = vsub.s32 5, %v1943_v30 }
 0xb1f   :  { %1553 = vmatprep.subr.bf16.mxu1 %v1684_v0 }
 0xb22   :  { %1554 = vmatpush3.bf16.msra.mxu1 %v1590_v57 }
 0xb23   :  { %1555 = vmatprep.subr.bf16.mxu1 %v1684_v0 }
 0xb26   :  { %1556 = vmatpush3.bf16.msra.mxu1 %v1591_v13 }
 0xb27   :  { %1557 = vmatprep.subr.bf16.mxu1 %v1684_v0  ;;  %v1223_v0 = vsub.s32 3, %v1943_v30 }
 0xb29   :  { %v1224_v26 = vrot.slane %v1949_v32, %v1223_v0 }
 0xb2a   :  { %1558 = vmatpush3.bf16.msra.mxu1 %v1592_v15 }
 0xbf0   :  { %v1094_v34 = vpop.f32.mrb[32].mxu1 }
 0xbf1   :  { %v1095_v35 = vadd.f32 %v1094_v34, %v1044_v33  ;;  %v1541_v36 = vpop.f32.mrb[33].mxu1 }
 0xbf2   :  { %v1097_v37 = vpop.f32.mrb[34].mxu1 }
 0xbf3   :  { %v1098_v38 = vadd.f32 %v1097_v37, %v1044_v33  ;;  %v1542_v39 = vpop.f32.mrb[35].mxu1  ;;  %v1101_v40 = vadd.f32 %v1095_v35, %v1775_v3 }
 0xbf5   :  { %v1103_v41 = vsel %vm71_vm1, %v1101_v40, 0.0  ;;  %v1102_v42 = vadd.f32 %v1098_v38, %v1780_v4  ;;  %v1588_v4 = vld [vmem:[#allocation3 + $0x8] sm:$0xff]  }
 0xbf6   :  { %1104 = vadd.xlane.f32.xlu0 %v1103_v41  ;;  %1546 = vmatpush3.bf16.msra.mxu0 %v1588_v4  ;;  %v1324_v4 = vsub.s32 4, %v1943_v30 }
 0xbf7   :  { %v1106_v43 = vsel %vm71_vm1, %v1102_v42, 0.0 }
 0xbf8   :  { %1107 = vadd.xlane.f32.xlu1 %v1106_v43  ;;  %v1325_v57 = vrot.slane %v1949_v32, %v1324_v4 }
 0xc83   :  { %v1105_v45 = vpop.xlane.xlu0 %1104 }
 0xc84   :  { %v1110_v46 = vmul.f32 0.03125, %v1105_v45 }
 0xc85   :  { %v1108_v47 = vpop.xlane.xlu1 %1107 }
 0xc86   :  { %v1112_v49 = vsub.f32 %v1101_v40, %v1110_v46  ;;  %v1111_v50 = vmul.f32 0.03125, %v1108_v47 }
 0xc88   :  { %v1113_v51 = vsub.f32 %v1102_v42, %v1111_v50  ;;  %v1114_v52 = vmul.f32 %v1112_v49, %v1112_v49 }
 0xc8a   :  { %v1116_v53 = vsel %vm71_vm1, %v1114_v52, 0.0  ;;  %v1115_v54 = vmul.f32 %v1113_v51, %v1113_v51 }
 0xc8b   :  { %1117 = vadd.xlane.f32.xlu0 %v1116_v53 }
 0xc8c   :  { %v1119_v3 = vsel %vm71_vm1, %v1115_v54, 0.0 }
 0xc8f   :  { %1120 = vadd.xlane.f32.xlu0 %v1119_v3 }
 0xd18   :  { %v1118_v11 = vpop.xlane.xlu0 %1117 }
 0xd19   :  { %v1122_v44 = vmul.f32 0.03125, %v1118_v11 }
 0xd1b   :  { %v1124_v48 = vadd.f32 1e-05, %v1122_v44 }
 0xd1c   :  { %v1121_v58 = vpop.xlane.xlu0 %1120 }
 0xd1d   :  { %1625 = vrsqrt.f32 %v1124_v48  ;;  %v1123_v59 = vmul.f32 0.03125, %v1121_v58  ;;  %v1331_v48 = vrot.slane %v1949_v32, %v1330_v56 }
 0xd1f   :  { %v1125_v60 = vadd.f32 1e-05, %v1123_v59 }
 0xd21   :  { %1627 = vrsqrt.f32 %v1125_v60 }
 0xd27   :  { %v1626_v62 = vpop.eup %1625 }
 0xd28   :  { %v1128_v1 = vmul.f32 %v1626_v62, %v1112_v49 }
 0xd2a   :  { %v1134_v6 = vmul.f32 %v1133_v63, %v1128_v1 }
 0xd2b   :  { %v1628_v5 = vpop.eup %1627 }
 0xd2c   :  { %v1129_v7 = vmul.f32 %v1628_v5, %v1113_v51  ;;  %v1140_v10 = vadd.f32 %v1139_v8, %v1134_v6 }
 0xd2e   :  { %v1135_v9 = vmul.f32 %v1133_v63, %v1129_v7 }
 0xd30   :  { %v1141_v12 = vadd.f32 %v1139_v8, %v1135_v9 }
 0xd32   :  { %v1142_v14 = vpack.c.bf16 %v1141_v12, %v1140_v10 }
 0xd34   :  { %1548 = vmatmul.mubr.msk.bf16.vlgmr.msra.gmra.mrb[36].mxu0 %vm71_vm1, %v1142_v14 }
 0xe07   :  { %v1203_v17 = vpop.f32.mrb[36].mxu0 }
 0xe08   :  { %v1204_v18 = vadd.f32 %v1376_v16, %v1203_v17  ;;  %v1549_v19 = vpop.f32.mrb[37].mxu0 }
 0xe09   :  { %v1206_v20 = vpop.f32.mrb[38].mxu0 }
 0xe0a   :  { %v1207_v21 = vadd.f32 %v1376_v16, %v1206_v20  ;;  %v1550_v22 = vpop.f32.mrb[39].mxu0  ;;  %v1210_v23 = vmax.f32 %v1204_v18, 0.0 }
 0xe0c   :  { %v1211_v24 = vmax.f32 %v1207_v21, 0.0 }
 0xe0e   :  { %v1212_v25 = vpack.c.bf16 %v1211_v24, %v1210_v23 }
 0xe10   :  { %1560 = vmatmul.mubr.msk.bf16.vlgmr.msra.gmra.mrb[36].mxu1 %vm1249_vm7, %v1212_v25 }
 0xee3   :  { %v1287_v27 = vpop.f32.mrb[36].mxu1 }
 0xee4   :  { %v1288_v28 = vadd.f32 %v1287_v27, %v1224_v26  ;;  %v1561_v29 = vpop.f32.mrb[37].mxu1 }
 0xee5   :  { %v1290_v31 = vpop.f32.mrb[38].mxu1 }
 0xee6   :  { %v1291_v33 = vadd.f32 %v1290_v31, %v1224_v26  ;;  %v1562_v34 = vpop.f32.mrb[39].mxu1  ;;  %v1294_v35 = vadd.f32 %v1288_v28, %v1140_v10 }
 0xee8   :  { %v1296_v36 = vsel %vm71_vm1, %v1294_v35, 0.0  ;;  %v1295_v37 = vadd.f32 %v1291_v33, %v1141_v12 }
 0xee9   :  { %1297 = vadd.xlane.f32.xlu1 %v1296_v36 }
 0xeea   :  { %v1299_v38 = vsel %vm71_vm1, %v1295_v37, 0.0 }
 0xeeb   :  { %1300 = vadd.xlane.f32.xlu0 %v1299_v38 }
 0xf76   :  { %v1298_v39 = vpop.xlane.xlu1 %1297 }
 0xf77   :  { %v1302_v40 = vmul.f32 0.03125, %v1298_v39 }
 0xf78   :  { %v1301_v41 = vpop.xlane.xlu0 %1300 }
 0xf79   :  { %v1304_v42 = vsub.f32 %v1294_v35, %v1302_v40  ;;  %v1303_v43 = vmul.f32 0.03125, %v1301_v41 }
 0xf7b   :  { %v1305_v45 = vsub.f32 %v1295_v37, %v1303_v43  ;;  %v1306_v46 = vmul.f32 %v1304_v42, %v1304_v42 }
 0xf7d   :  { %v1308_v47 = vsel %vm71_vm1, %v1306_v46, 0.0  ;;  %v1307_v49 = vmul.f32 %v1305_v45, %v1305_v45 }
 0xf7e   :  { %1309 = vadd.xlane.f32.xlu1 %v1308_v47 }
 0xf7f   :  { %v1311_v50 = vsel %vm71_vm1, %v1307_v49, 0.0 }
 0xf80   :  { %1312 = vadd.xlane.f32.xlu0 %v1311_v50 }
0x100b   :  { %v1310_v51 = vpop.xlane.xlu1 %1309 }
0x100c   :  { %v1314_v52 = vmul.f32 0.03125, %v1310_v51 }
0x100d   :  { %v1313_v53 = vpop.xlane.xlu0 %1312 }
0x100e   :  { %v1316_v54 = vadd.f32 1e-05, %v1314_v52  ;;  %v1315_v3 = vmul.f32 0.03125, %v1313_v53 }
0x1010   :  { %1629 = vrsqrt.f32 %v1316_v54  ;;  %v1317_v55 = vadd.f32 1e-05, %v1315_v3 }
0x1012   :  { %1631 = vrsqrt.f32 %v1317_v55 }
0x101a   :  { %v1630_v11 = vpop.eup %1629 }
0x101b   :  { %v1320_v44 = vmul.f32 %v1630_v11, %v1304_v42 }
0x101c   :  { %v1632_v58 = vpop.eup %1631 }
0x101d   :  { %v1326_v59 = vmul.f32 %v1325_v57, %v1320_v44  ;;  %v1321_v60 = vmul.f32 %v1632_v58, %v1305_v45 }
0x101f   :  { %v1327_v61 = vmul.f32 %v1325_v57, %v1321_v60  ;;  %v1332_v62 = vadd.f32 %v1331_v48, %v1326_v59 }
0x1021   :  { %v1333_v63 = vadd.f32 %v1331_v48, %v1327_v61  ;;  %1334 = vst.msk [vmem:[#allocation6] sm:$0xff] %vm71_vm1, %v1332_v62 }
0x1023   :  { %1335 = vst.msk [vmem:[#allocation6 + $0x8] sm:$0xff] %vm71_vm1, %v1333_v63 }
0x1024   :  { %1666 = shalt.err (!%p1663_p12)
}
0x1025   :  { %s1667_s29 = scalar_lea.hbm %s2015_s8, 256 }
0x1026   :  { %p1668_p13 = scmp.ne.s32.totalorder %s2015_s8, %s1667_s29  ;;  %p1671_p0 = scmp.lt.u32.totalorder %s1667_s29, %s2015_s8 }
0x1028   :  { %p1673_p1 = pnand %p1671_p0, %p1668_p13 }
0x102a   :  { %1676 = shalt.err (!%p1673_p1)
}
0x102b   :  { %s1700_s12 = smov 128  }
0x102c   :  { %1347 = dma.vmem_to_hbm [thread:$0]  %s1342_s6, 256, %s2015_s8, [#allocation5], %s1700_s12, %s1700_s12, %s1696_s13  }
0x102d   :  { %1679 = dma.done.wait [#allocation5], 256  }
0x102e   :  { %1680 = vsyncadd [#allocation5], 4294967040 }
0x102f   :  { %1351 = vsyncpa [#allocation4], 1 }
0x1030   :  { %1352 = vsyncpa [#allocation5], 1 }

</bundles_post_ra>
